<compile_context>
chip_gen: v7x
topology: tpu7x:2x2x1
jax: 0.10.0
libtpu: 0.0.40
codegen_flags: <defaults>
</compile_context>

<pallas_src>
import jax
import jax.numpy as jnp
from jax.experimental import pallas as pl
from jax.experimental.pallas import tpu as pltpu


# ---------------------------------------------------------------------------
# Kernel: 1x1 conv == channel matmul + bias, one (batch item, spatial tile) per step
# ---------------------------------------------------------------------------
def _linear_kernel(x_ref, w_ref, b_ref, o_ref):
    # x_ref: (1, C, TM)    input channels x spatial tile for one batch item
    # w_ref: (c_out, C)    Conv2d(kernel=1) weight, squeezed (resident across steps)
    # b_ref: (c_out, 1)    bias as a column vector (broadcasts over lanes)
    # o_ref: (1, c_out, TM)
    out = jnp.dot(w_ref[...], x_ref[0], preferred_element_type=jnp.float32)
    o_ref[0] = (out + b_ref[...]).astype(o_ref.dtype)


# ---------------------------------------------------------------------------
# Tile selection
# ---------------------------------------------------------------------------
def _pick_spatial_tile(M, C, c_out, itemsize=4, vmem_budget=8 * 1024 * 1024):
    """Largest lane-aligned (multiple-of-128) tile of the flattened spatial dim that
    divides M and keeps double-buffered x/out tiles inside a conservative VMEM budget.
    Falls back to the full dim when M is not 128-aligned (full-extent block is legal)."""
    if M % 128 != 0:
        return M
    # Per-step bytes ~ 2 * (C + c_out) * tm * itemsize (double-buffered in + out tiles).
    per_lane = 2 * (C + c_out) * itemsize
    cap = max(128, (vmem_budget // per_lane) // 128 * 128)
    tm = min(cap, M)
    while M % tm != 0:
        tm -= 128
    return tm


# ---------------------------------------------------------------------------
# Wrapper
# ---------------------------------------------------------------------------
def linear_forward(x, w, b):
    """x: (N, C, V, L); w: (c_out, C) or (c_out, C, 1, 1); b: (c_out,) or None."""
    N, C, V, L = x.shape
    if w.ndim == 4:  # PyTorch Conv2d weight layout (c_out, c_in, 1, 1)
        w = w.reshape(w.shape[0], w.shape[1])
    c_out = w.shape[0]
    M = V * L

    if b is None:
        b = jnp.zeros((c_out,), dtype=x.dtype)

    # Free reshape (same memory layout) -> no extra HBM pass.
    x2 = x.reshape(N, C, M)

    tm = _pick_spatial_tile(M, C, c_out, itemsize=x.dtype.itemsize)
    grid = (N, M // tm)

    out = pl.pallas_call(
        _linear_kernel,
        out_shape=jax.ShapeDtypeStruct((N, c_out, M), x.dtype),
        grid=grid,
        in_specs=[
            pl.BlockSpec((1, C, tm), lambda n, m: (n, 0, m)),
            pl.BlockSpec((c_out, C), lambda n, m: (0, 0)),   # resident weight
            pl.BlockSpec((c_out, 1), lambda n, m: (0, 0)),   # resident bias
        ],
        out_specs=pl.BlockSpec((1, c_out, tm), lambda n, m: (n, 0, m)),
        compiler_params=pltpu.CompilerParams(
            dimension_semantics=("parallel", "parallel"),
            vmem_limit_bytes=64 * 1024 * 1024,
        ),
    )(x2, w, b.reshape(c_out, 1))

    # Free reshape back to the PyTorch layout.
    return out.reshape(N, c_out, V, L)


# ---------------------------------------------------------------------------
# Pure-JAX reference (mirrors the PyTorch forward exactly)
# ---------------------------------------------------------------------------
def linear_ref(x, w, b):
    if w.ndim == 4:
        w = w.reshape(w.shape[0], w.shape[1])
    out = jnp.einsum("oc,ncvl->novl", w, x)
    if b is not None:
        out = out + b[None, :, None, None]
    return out


if __name__ == "__main__":
    # Module config: linear(c_in, c_out) == Conv2d(c_in, c_out, kernel_size=1)
    N, c_in, V, L = 2, 4, 16, 8        # flattened spatial V*L = 128 -> lane-dense output
    c_out = 32

    key = jax.random.PRNGKey(0)
    kx, kw, kb = jax.random.split(key, 3)

    x = jax.random.normal(kx, (N, c_in, V, L), dtype=jnp.float32)
    w = 0.1 * jax.random.normal(kw, (c_out, c_in), dtype=jnp.float32)
    b = 0.1 * jax.random.normal(kb, (c_out,), dtype=jnp.float32)

    y = linear_forward(x, w, b)
    y = jax.block_until_ready(y)

    y_ref = linear_ref(x, w, b)

    assert y.shape == (N, c_out, V, L), y.shape
    assert jnp.allclose(y, y_ref, atol=1e-4, rtol=1e-4), float(jnp.max(jnp.abs(y - y_ref)))
    print("KERNEL_OK")
</pallas_src>

<mosaic_0001>
module attributes {stable_mosaic.version = 11 : i64} {
  func.func @_linear_kernel(%arg0: i32, %arg1: i32, %arg2: memref<1x4x128xf32, #tpu.memory_space<vmem>>, %arg3: memref<32x4xf32, #tpu.memory_space<vmem>>, %arg4: memref<32x1xf32, #tpu.memory_space<vmem>>, %arg5: memref<1x32x128xf32, #tpu.memory_space<vmem>>) attributes {dimension_semantics = [#tpu.dimension_semantics<parallel>, #tpu.dimension_semantics<parallel>], iteration_bounds = array<i64: 2, 1>, scalar_prefetch = 0 : i64, scratch_operands = 0 : i64, tpu.core_type = #tpu.core_type<tc>, window_params = [{transform_indices = @transform_0, window_bounds = array<i64: 1, 4, 128>}, {pipeline_mode = #tpu.pipeline_mode<synchronous>, transform_indices = @transform_1, window_bounds = array<i64: 32, 4>}, {pipeline_mode = #tpu.pipeline_mode<synchronous>, transform_indices = @transform_2, window_bounds = array<i64: 32, 1>}, {transform_indices = @transform_3, window_bounds = array<i64: 1, 32, 128>}]} {
    %c0 = arith.constant 0 : index
    %c0_0 = arith.constant 0 : index
    %0 = vector.load %arg3[%c0, %c0_0] : memref<32x4xf32, #tpu.memory_space<vmem>>, vector<32x4xf32>
    %c0_1 = arith.constant 0 : index
    %c0_2 = arith.constant 0 : index
    %c0_3 = arith.constant 0 : index
    %1 = vector.load %arg2[%c0_1, %c0_2, %c0_3] : memref<1x4x128xf32, #tpu.memory_space<vmem>>, vector<1x4x128xf32>
    %2 = vector.shape_cast %1 : vector<1x4x128xf32> to vector<4x128xf32>
    %cst = arith.constant dense<0.000000e+00> : vector<32x128xf32>
    %3 = tpu.matmul %0, %2, %cst {dimension_numbers = #tpu.dot_dimension_numbers<[1], [0], [0], [1], [0, 0, 1, 1], [], []>} : vector<32x4xf32>, vector<4x128xf32>, vector<32x128xf32> -> vector<32x128xf32>
    %c0_4 = arith.constant 0 : index
    %c0_5 = arith.constant 0 : index
    %4 = vector.load %arg4[%c0_4, %c0_5] : memref<32x1xf32, #tpu.memory_space<vmem>>, vector<32x1xf32>
    %5 = vector.broadcast %4 : vector<32x1xf32> to vector<32x128xf32>
    %6 = arith.addf %3, %5 : vector<32x128xf32>
    %c0_6 = arith.constant 0 : index
    %c0_7 = arith.constant 0 : index
    %c0_8 = arith.constant 0 : index
    %7 = vector.load %arg5[%c0_6, %c0_7, %c0_8] : memref<1x32x128xf32, #tpu.memory_space<vmem>>, vector<1x32x128xf32>
    %8 = vector.shape_cast %7 : vector<1x32x128xf32> to vector<32x128xf32>
    %9 = vector.shape_cast %6 : vector<32x128xf32> to vector<1x32x128xf32>
    tpu.vector_store %arg5[%c0_6, %c0_7, %c0_8], %9 {strides = array<i32>} : memref<1x32x128xf32, #tpu.memory_space<vmem>>, vector<1x32x128xf32>,
    return
  }
  func.func @transform_0(%arg0: i32, %arg1: i32) -> (i32, i32, i32) {
    %c0_i32 = arith.constant 0 : i32
    %c0_i32_0 = arith.constant 0 : i32
    return %arg0, %c0_i32, %arg1 : i32, i32, i32
  }
  func.func @transform_1(%arg0: i32, %arg1: i32) -> (i32, i32) {
    %c0_i32 = arith.constant 0 : i32
    %c0_i32_0 = arith.constant 0 : i32
    %c0_i32_1 = arith.constant 0 : i32
    return %c0_i32, %c0_i32_0 : i32, i32
  }
  func.func @transform_2(%arg0: i32, %arg1: i32) -> (i32, i32) {
    %c0_i32 = arith.constant 0 : i32
    %c0_i32_0 = arith.constant 0 : i32
    %c0_i32_1 = arith.constant 0 : i32
    return %c0_i32, %c0_i32_0 : i32, i32
  }
  func.func @transform_3(%arg0: i32, %arg1: i32) -> (i32, i32, i32) {
    %c0_i32 = arith.constant 0 : i32
    %c0_i32_0 = arith.constant 0 : i32
    return %arg0, %c0_i32, %arg1 : i32, i32, i32
  }
}

</mosaic_0001>

<bundles_post_ra>
// kernel: tpu_custom_call.1
= control target key start
LH: loop header
LB: loop body
LE: loop exit
PB: predicated region body
PF: predicated region fallthrough
CT: control target
= control target key end

     0   :  { %8 = vsyncpa [#allocation3], 0  ;;  %s1070_s0 = inlined_call_operand.hbm [shape: f32[2,4,128], index: 0, kind: input, shape index: {}]   ;;  %s1071_s1 = inlined_call_operand.hbm [shape: f32[32,4], index: 1, kind: input, shape index: {}]   ;;  %s1072_s2 = inlined_call_operand.hbm [shape: f32[32,1], index: 2, kind: input, shape index: {}]   ;;  %s1073_s3 = inlined_call_operand.hbm [shape: f32[2,32,128], index: 3, kind: output, shape index: {}]  }
   0x1   :  { %10 = vsyncpa [#allocation3 + $0x1], 0 }
   0x2   :  { %11 = vsyncpa [#allocation6], 0 }
   0x3   :  { %12 = vsyncpa [#allocation4], 0 }
   0x4   :  { %14 = vsyncpa [#allocation4 + $0x1], 0  ;;  %s817_s12 = smov 0   ;;  %s819_s13 = smov 0  }
   0x5   :  { %s821_s14 = smov 0   ;;  %s823_s15 = smov 0  }
   0x6   :  { %s825_s16 = smov 0   ;;  %s827_s17 = smov 0  }
   0x7 LB: > { %s485_s18 = sadd.s32 4294967295, %s786_s17   ;;  %s486_s19 = sadd.s32 4294967294, %s786_s17   ;;  %s786_s17 = sphi %s827_s17, %s20_s17   ;;  %s782_s16 = sphi %s825_s16, %s1095_s16   ;;  %s778_s15 = sphi %s823_s15, %s1094_s15   ;;  %s774_s14 = sphi %s821_s14, %s1093_s14   ;;  %s770_s13 = sphi %s819_s13, %s1092_s13   ;;  %s766_s12 = sphi %s817_s12, %s1091_s12  }
   0x8   : > { %p54_p0 = scmp.ne.s32.totalorder %s770_s13, %s766_s12  ;;  %p851_p1 = scmp.eq.s32.totalorder %s485_s18, 0 }
   0x9   : > { %p855_p2 = scmp.eq.s32.totalorder %s485_s18, 1  ;;  %p128_p3 = scmp.eq.s32.totalorder %s486_s19, 1 }
   0xa   : > { %s1078_s20 = scalar_select %p851_p1, 1, 0 }
   0xb   : > { %p861_p4 = por %p851_p1, %p54_p0  ;;  %p487_p5 = scmp.ge.s32.totalorder %s786_s17, 1 }
   0xc   : > { %p866_p6 = por %p128_p3, %p54_p0  ;;  %p135_p7 = scmp.lt.s32.totalorder %s786_s17, 3 }
   0xd   : > { %s1080_s22 = scalar_select %p861_p4, 1, 0 }
   0xe   : > { %s1081_s23 = scalar_select %p866_p6, 1, 0 }
   0xf   : > { %p871_p8 = pnand %p487_p5, %p135_p7  ;;  %s788_s25 = smov [#allocation5]  }
  0x10   : > { %s147_s26 = sshll.u32 %s788_s25, 4  ;;  %s789_s28 = smov [#allocation7]   ;;  %s875_s26 = int_to_ptr.vmem [resolvable:$true] %s147_s26 }
  0x11   : > { %p536_p9 = pneg %p871_p8  ;;  %s160_s29 = sshll.u32 %s789_s28, 4  ;;  %s886_s29 = int_to_ptr.vmem [resolvable:$true] %s160_s29 }
  0x12   : > { %s614_s5 = scalar_lea.hbm %s1071_s1, 512 }
  0x13   : > { %p882_p11 = pnand %p536_p9, %p851_p1  ;;  %p615_p12 = scmp.ne.s32.totalorder %s1071_s1, %s614_s5 }
  0x14   : > { %p621_p5 = scmp.lt.u32.totalorder %s614_s5, %s1071_s1 }
  0x15   : > { %p616_p13 = pneg %p882_p11 }
  0x17   : > { %p617_p0 = pnand %p616_p13, %p615_p12 }
  0x19   : > { %p618_p3 = pneg %p617_p0 }
  0x1b   : > { %p623_p7 = pnand %p621_p5, %p618_p3 }
  0x1d   : > { %626 = shalt.err (!%p623_p7)
}
  0x1e   : > { %s627_s10 = scalar_lea.vmem %s875_s26, 512  ;;  %p635_p1 = scmp.lt.s32.totalorder %s875_s26, %s875_s26 }
  0x1f   : > { %p628_p9 = scmp.ne.s32.totalorder %s875_s26, %s627_s10  ;;  %p636_p12 = scmp.lt.s32.totalorder %s627_s10, %s627_s10 }
  0x21   : > { %p630_p10 = pnand %p628_p9, %p616_p13  ;;  %p637_p0 = por %p636_p12, %p635_p1 }
  0x23   : > { %p631_p6 = pneg %p630_p10 }
  0x25   : > { %p638_p4 = pnand %p637_p0, %p631_p6 }
  0x27   : > { %641 = shalt.err (!%p638_p4)
}
  0x28   : > { %s790_s11 = smov 128   ;;  %s791_s18 = smov 8  }
  0x29   : > { %539 = dma.hbm_to_vmem [thread:$0]  (!%p882_p11), %s1071_s1, 512, %s875_s26, [#allocation6], %s790_s11, %s790_s11, %s791_s18  }
  0x2a   : > { %s642_s4 = scalar_lea.hbm %s1072_s2, 512 }
  0x2b   : > { %p643_p1 = scmp.ne.s32.totalorder %s1072_s2, %s642_s4  ;;  %p649_p10 = scmp.lt.u32.totalorder %s642_s4, %s1072_s2 }
  0x2d   : > { %p645_p4 = pnand %p643_p1, %p616_p13 }
  0x2f   : > { %p646_p6 = pneg %p645_p4 }
  0x31   : > { %p651_p3 = pnand %p649_p10, %p646_p6 }
  0x33   : > { %654 = shalt.err (!%p651_p3)
}
  0x34   : > { %s655_s26 = scalar_lea.vmem %s886_s29, 512  ;;  %p663_p12 = scmp.lt.s32.totalorder %s886_s29, %s886_s29 }
  0x35   : > { %p656_p5 = scmp.ne.s32.totalorder %s886_s29, %s655_s26  ;;  %p664_p0 = scmp.lt.s32.totalorder %s655_s26, %s655_s26 }
  0x37   : > { %p658_p7 = pnand %p656_p5, %p616_p13  ;;  %p665_p1 = por %p664_p0, %p663_p12 }
  0x39   : > { %p659_p9 = pneg %p658_p7 }
  0x3b   : > { %p666_p4 = pnand %p665_p1, %p659_p9 }
  0x3d   : > { %669 = shalt.err (!%p666_p4)
}
  0x3e   : > { %542 = dma.hbm_to_vmem [thread:$0]  (!%p882_p11), %s1072_s2, 512, %s886_s29, [#allocation6], %s790_s11, %s790_s11, %s791_s18  }
  0x3f   : > { %s32_s19 = sadd.s32 1, %s782_s16  ;;  %s41_s25 = sadd.s32 1, %s774_s14 }
  0x40   : > { %p34_p13 = scmp.ge.s32.totalorder %s32_s19, 2  ;;  %p48_p6 = scmp.ne.s32.totalorder %s774_s14, %s770_s13 }
  0x41   : > { %p49_p10 = scmp.eq.s32.totalorder %s786_s17, 0  ;;  %p553_p3 = scmp.lt.s32.totalorder %s786_s17, 2 }
  0x42   : > { %s1097_s19 = smov (%p34_p13, %s32_s19), 0  ;;  %p950_p7 = por %p855_p2, %p48_p6 }
  0x43   : > { %p50_p5 = por %p49_p10, %p48_p6  ;;  %s36_s28 = ssub.s32 %s782_s16, %s1097_s19 }
  0x44   : > { %s1084_s27 = scalar_select %p950_p7, 1, 0 }
  0x45   : > { %s174_s30 = sand.u32 1, %s774_s14   ;;  %p39_p9 = scmp.eq.s32.totalorder %s36_s28, 0 }
  0x46   : > { %s491_s29 = sshll.u32 %s174_s30, 2  ;;  %s492_s11 = sshll.u32 %s782_s16, 6 }
  0x47   : > { %s959_s18 = scalar_select %p39_p9, %s774_s14, %s41_s25  }
  0x48   : > { %s964_s6 = scalar_lea.hbm %s1070_s0, %s492_s11  ;;  %s178_s21 = scalar_lea.vmem [#allocation2], %s491_s29 }
  0x49   : > { %s186_s7 = sshll.u32 %s178_s21, 4  ;;  %p968_p2 = pnand %p553_p3, %p50_p5  ;;  %s972_s7 = int_to_ptr.vmem [resolvable:$true] %s186_s7 }
  0x4a   : > { %s175_s26 = scalar_lea.sflag [#allocation3], %s174_s30  ;;  %s670_s9 = scalar_lea.hbm %s964_s6, 64 }
  0x4b   : > { %p671_p11 = scmp.ne.s32.totalorder %s964_s6, %s670_s9  ;;  %p672_p12 = pneg %p968_p2 }
  0x4c   : > { %s675_s28 = scalar_lea.hbm %s1070_s0, 128  ;;  %p676_p4 = scmp.lt.u32.totalorder %s964_s6, %s1070_s0 }
  0x4d   : > { %p673_p0 = pnand %p672_p12, %p671_p11  ;;  %p677_p13 = scmp.lt.u32.totalorder %s675_s28, %s670_s9 }
  0x4e   : > { %p679_p10 = scmp.lt.u32.totalorder %s670_s9, %s964_s6 }
  0x4f   : > { %p674_p1 = pneg %p673_p0  ;;  %p678_p6 = por %p677_p13, %p676_p4 }
  0x51   : > { %p680_p3 = por %p679_p10, %p678_p6 }
  0x53   : > { %p681_p5 = pnand %p680_p3, %p674_p1 }
  0x55   : > { %684 = shalt.err (!%p681_p5)
}
  0x56   : > { %s685_s30 = scalar_lea.vmem %s972_s7, 64  ;;  %s792_s4 = smov [#allocation2]  }
  0x57   : > { %p686_p9 = scmp.ne.s32.totalorder %s972_s7, %s685_s30  ;;  %s690_s5 = sshll.u32 %s792_s4, 4  ;;  %s691_s5 = int_to_ptr.vmem [resolvable:$false] %s690_s5 }
  0x58   : > { %s692_s21 = scalar_lea.vmem %s691_s5, 128  ;;  %p693_p7 = scmp.lt.s32.totalorder %s972_s7, %s691_s5 }
  0x59   : > { %p688_p11 = pnand %p686_p9, %p672_p12  ;;  %p694_p4 = scmp.lt.s32.totalorder %s692_s21, %s685_s30 }
  0x5b   : > { %p689_p0 = pneg %p688_p11  ;;  %p695_p13 = por %p694_p4, %p693_p7 }
  0x5d   : > { %p696_p6 = pnand %p695_p13, %p689_p0 }
  0x5f   : > { %699 = shalt.err (!%p696_p6)
}
  0x60   : > { %546 = dma.hbm_to_vmem [thread:$0]  (!%p968_p2), %s964_s6, 64, %s972_s7, %s175_s26  }
  0x61   : > { %195 = sbr.rel (%p871_p8) target bundleno = 343 (0x157), region = 32  ;;  %s1002_s9 = sand.u32 (!%p871_p8), 1, %s770_s13  }
  0x62   : > { %s494_s10 = sshll.u32 (!%p871_p8), %s1002_s9, 2  ;;  %s198_s25 = scalar_lea.sflag (!%p871_p8), [#allocation3], %s1002_s9 }
  0x63   : > { %s201_s28 = scalar_lea.vmem (!%p871_p8), [#allocation2], %s494_s10  ;;  %p1086_p7 = scmp.ne.s32.totalorder (!%p871_p8), %s1080_s22, 0 }
  0x68   : > { %753 = dma.done.wait (%p1086_p7), %s198_s25, 64  }
  0x69   : > { %755 = vsyncadd (%p1086_p7), %s198_s25, 4294967232  ;;  %p1087_p12 = scmp.ne.s32.totalorder %s1078_s20, 0 }
  0x6b   : > { %757 = dma.done.wait (%p1087_p12), [#allocation6], 1024  }
  0x6c   : > { %759 = vsyncadd (%p1087_p12), [#allocation6], 4294966272  ;;  %v793_v0 = vmov 0   ;;  %vm274_vm0 = vcmask 1043456   ;;  %v236_v1 = vld [vmem:[%s201_s28] sm:$0xf] }
  0x6d   : > { %613 = vset.pattern.permute.xlu1 %v793_v0  ;;  %612 = vset.pattern.permute.xlu0 %v793_v0  ;;  %v232_v2 = vld [vmem:[#allocation5] sm:$0xff]  ;;  %vm261_vm1 = vcmask 31744   ;;  %v234_v3 = vld [vmem:[#allocation5 + $0x10] sm:$0xff]  ;;  %v233_v4 = vld [vmem:[#allocation5 + $0x8] sm:$0xff]  ;;  %s497_s20 = sshll.u32 %s1002_s9, 5  ;;  %s508_s6 = sshll.u32 %s778_s15, 9 }
  0x6e   : > { %514 = vmatprep.subr.msk.mxu0 %vm274_vm0, %v236_v1  ;;  %522 = vmatprep.subr.msk.mxu1 %vm274_vm0, %v236_v1  ;;  %v235_v5 = vld [vmem:[#allocation5 + $0x18] sm:$0xff]  ;;  %v239_v6 = vld [vmem:[#allocation7 + $0x10] sm:$0xff]  ;;  %v237_v7 = vld [vmem:[#allocation7] sm:$0xff]  ;;  %s231_s22 = scalar_lea.vmem [#allocation8], %s497_s20  ;;  %s1021_s26 = scalar_lea.hbm %s1073_s3, %s508_s6 }
  0x6f   : > { %515 = vmatpush3.msk.msra.mxu0 %vm274_vm0, %v236_v1  ;;  %523 = vmatpush3.msk.msra.mxu1 %vm274_vm0, %v236_v1  ;;  %v240_v8 = vld [vmem:[#allocation7 + $0x18] sm:$0xff]  ;;  %v238_v9 = vld [vmem:[#allocation7 + $0x8] sm:$0xff]  ;;  %s382_s24 = sshll.u32 %s231_s22, 4  ;;  %s368_s15 = scalar_lea.sflag [#allocation4], %s1002_s9  ;;  %s1016_s24 = int_to_ptr.vmem [resolvable:$true] %s382_s24 }
  0x70   : > { %516 = vmatprep.mubr.msk.f32.mxu0 %vm261_vm1, %v232_v2  ;;  %519 = vmatprep.mubr.msk.f32.mxu1 %vm261_vm1, %v234_v3  ;;  %s700_s29 = scalar_lea.vmem %s1016_s24, 512  ;;  %p1088_p2 = scmp.ne.s32.totalorder %s1084_s27, 0 }
  0x71   : > { %517 = vmatmul.mubr.msk.f32.vlgmr.msra.gmra.mrb[0].mxu0 %vm261_vm1, %v233_v4  ;;  %520 = vmatmul.mubr.msk.f32.vlgmr.msra.gmra.mrb[0].mxu1 %vm261_vm1, %v235_v5  ;;  %p701_p8 = scmp.ne.s32.totalorder %s1016_s24, %s700_s29  ;;  %s794_s11 = smov [#allocation8]  }
  0x72   : > { %253 = vperm.xlu1 %613, %v239_v6   ;;  %243 = vperm.xlu0 %612, %v237_v7   ;;  %s704_s30 = sshll.u32 %s794_s11, 4  ;;  %s705_s30 = int_to_ptr.vmem [resolvable:$false] %s704_s30 }
  0x73   : > { %p702_p1 = pnand %p701_p8, %p1088_p2  ;;  %s706_s4 = scalar_lea.vmem %s705_s30, 1024 }
  0x74   : > { %p707_p3 = scmp.lt.s32.totalorder %s1016_s24, %s705_s30  ;;  %p708_p5 = scmp.lt.s32.totalorder %s706_s4, %s700_s29 }
  0x75   : > { %p703_p10 = pneg %p702_p1 }
  0x76   : > { %258 = vperm.xlu1 %613, %v240_v8   ;;  %248 = vperm.xlu0 %612, %v238_v9   ;;  %p709_p9 = por %p708_p5, %p707_p3 }
  0x78   : > { %p710_p11 = pnand %p709_p9, %p703_p10 }
  0xf1   : > { %v254_v10 = vpop.permute.xlu1 %253  ;;  %v244_v11 = vpop.permute.xlu0 %243 }
  0xf5   : > { %v259_v12 = vpop.permute.xlu1 %258  ;;  %v249_v13 = vpop.permute.xlu0 %248 }
 0x144   : > { %v518_v14 = vpop.f32.mrb[0].mxu0  ;;  %v521_v15 = vpop.f32.mrb[0].mxu1 }
 0x145   : > { %v350_v16 = vadd.f32 %v518_v14, %v249_v13  ;;  %v360_v17 = vadd.f32 %v521_v15, %v259_v12  ;;  %v344_v18 = vpop.f32.mrb[1].mxu0  ;;  %v354_v19 = vpop.f32.mrb[1].mxu1 }
 0x146   : > { %v345_v20 = vadd.f32 %v344_v18, %v244_v11  ;;  %v355_v21 = vadd.f32 %v354_v19, %v254_v10 }
 0x147   : > { %364 = vst [vmem:[%s231_s22 + $0x8] sm:$0xff] %v350_v16  ;;  %366 = vst [vmem:[%s231_s22 + $0x18] sm:$0xff] %v360_v17 }
 0x148   : > { %363 = vst [vmem:[%s231_s22] sm:$0xff] %v345_v20  ;;  %365 = vst [vmem:[%s231_s22 + $0x10] sm:$0xff] %v355_v21 }
 0x149   : > { %713 = shalt.err (!%p710_p11)
}
 0x14a   : > { %s714_s5 = scalar_lea.hbm %s1021_s26, 512  ;;  %s718_s25 = scalar_lea.hbm %s1073_s3, 1024 }
 0x14b   : > { %p715_p0 = scmp.ne.s32.totalorder %s1021_s26, %s714_s5  ;;  %p719_p6 = scmp.lt.u32.totalorder %s1021_s26, %s1073_s3 }
 0x14c   : > { %p720_p7 = scmp.lt.u32.totalorder %s718_s25, %s714_s5  ;;  %p722_p8 = scmp.lt.u32.totalorder %s714_s5, %s1021_s26 }
 0x14d   : > { %p716_p4 = pnand %p715_p0, %p1088_p2 }
 0x14e   : > { %p721_p12 = por %p720_p7, %p719_p6 }
 0x14f   : > { %p717_p13 = pneg %p716_p4 }
 0x150   : > { %p723_p1 = por %p722_p8, %p721_p12 }
 0x152   : > { %p724_p10 = pnand %p723_p1, %p717_p13 }
 0x154   : > { %727 = shalt.err (!%p724_p10)
}
 0x155   : > { %s795_s22 = smov 128   ;;  %s796_s6 = smov 8  }
 0x156   : > { %534 = dma.vmem_to_hbm [thread:$0]  (%p1088_p2), %s1016_s24, 512, %s1021_s26, %s368_s15, %s795_s22, %s795_s22, %s796_s6  }
 0x157 PF: > { %s397_s7 = sand.u32 1, %s766_s12   ;;  %p1089_p3 = scmp.ne.s32.totalorder %s1081_s23, 0 }
 0x158   : > { %p1090_p5 = scmp.ge.s32.totalorder %s786_s17, 2  ;;  %s398_s8 = scalar_lea.sflag [#allocation4], %s397_s7 }
 0x15a   : > { %p548_p9 = pnand %p1090_p5, %p1089_p3 }
 0x15c   : > { %761 = dma.done.wait (!%p548_p9), %s398_s8, 512  }
 0x15d   : > { %763 = vsyncadd (!%p548_p9), %s398_s8, 4294966784  ;;  %s20_s17 = sadd.s32 1, %s786_s17   ;;  %s1091_s12 = smov %s770_s13 }
 0x15e   : > { %p17_p11 = scmp.ge.s32.totalorder %s20_s17, 4   ;;  %s1092_s13 = smov %s774_s14 }
 0x15f   : > { %s1093_s14 = smov %s959_s18  ;;  %s1094_s15 = smov %s782_s16 }
 0x160   : > { %s1095_s16 = smov %s1097_s19  ;;  %19 = sbr.rel (!%p17_p11) target bundleno = 7 (0x7), region = 85 }
 0x167   :  { %403 = vsyncpa [#allocation3], 1 }
 0x168   :  { %405 = vsyncpa [#allocation3 + $0x1], 1 }
 0x169   :  { %406 = vsyncpa [#allocation6], 1 }
 0x16a   :  { %407 = vsyncpa [#allocation4], 1 }
 0x16b   :  { %409 = vsyncpa [#allocation4 + $0x1], 1 }

</bundles_post_ra>
